<compile_context>
chip_gen: v5e
topology: v5e:2x2
jax: 0.10.0
libtpu: 0.0.40
codegen_flags: <defaults>
</compile_context>

<pallas_src>
import jax
import jax.numpy as jnp
from jax.experimental import pallas as pl
from jax.experimental.pallas import tpu as pltpu


def mlp_kernel(x_ref,
               w0_ref, b0_ref,
               w1_ref, b1_ref,
               w2_ref, b2_ref,
               w3_ref, b3_ref,
               w4_ref, b4_ref,
               w5_ref, b5_ref,
               out_ref):
    # Batch-in-lanes: every tensor here is (features, tile_b); the batch
    # (multiple of 128) lives on the lane axis, so all ops are lane-dense.
    h = x_ref[...]                                   # (D, tile_b) f32

    def dense(h, w_ref, b_ref):
        # (out, in) @ (in, tile_b) on the MXU, f32 accumulation.
        y = jnp.dot(w_ref[...], h.astype(w_ref.dtype),
                    preferred_element_type=jnp.float32)
        return y + b_ref[...]                        # (out, 1) bias bcast over lanes

    h = jnp.maximum(dense(h, w0_ref, b0_ref), 0.0)   # D   -> 32
    h = jnp.maximum(dense(h, w1_ref, b1_ref), 0.0)   # 32  -> 64
    h = jnp.maximum(dense(h, w2_ref, b2_ref), 0.0)   # 64  -> 128
    h = jnp.maximum(dense(h, w3_ref, b3_ref), 0.0)   # 128 -> 64
    h = jnp.maximum(dense(h, w4_ref, b4_ref), 0.0)   # 64  -> 32

    logits = dense(h, w5_ref, b5_ref)                # (1, tile_b), lane-dense
    out_ref[...] = jax.nn.sigmoid(logits)


def _round_up(v, m):
    return ((v + m - 1) // m) * m


def mlp_forward(x, params, *, tile_b=2048, use_bf16=True):
    """x: [B, D] float32; params: list of (W[in,out], b[1,out]) f32 arrays."""
    B, D = x.shape
    f32 = jnp.float32
    mm_dtype = jnp.bfloat16 if use_bf16 else f32

    # ---- batch tile selection ------------------------------------------
    b_min = _round_up(B, 128)
    tb = min(tile_b, b_min)
    # Keep >= 2 grid steps for medium/large batches so v7x can shard tiles
    # across both TensorCores (no cost on v5e/v6e).
    if b_min >= 256:
        tb = min(tb, (b_min // 2) // 128 * 128)
    tb = max(128, tb // 128 * 128)
    b_pad = _round_up(B, tb)
    grid = (b_pad // tb,)

    # ---- inputs: x stays f32 (bf16 cast happens in-kernel), transposed so
    # the batch sits on the lane axis. ------------------------------------
    x_t = jnp.transpose(x.astype(f32))               # (D, B)
    if b_pad != B:
        x_t = jnp.pad(x_t, ((0, 0), (0, b_pad - B)))

    # Weights as (out, in) in the matmul dtype, biases as (out, 1) f32.
    flat = []
    for w, b in params:
        flat.append(jnp.transpose(w).astype(mm_dtype))     # (out, in)
        flat.append(jnp.reshape(b, (-1, 1)).astype(f32))    # (out, 1)

    x_spec = pl.BlockSpec((D, tb), lambda i: (0, i))
    const_spec = lambda a: pl.BlockSpec(a.shape, lambda i: (0, 0))
    in_specs = [x_spec] + [const_spec(a) for a in flat]
    # Lane-dense output: one (1, tile_b) row per grid step.
    out_spec = pl.BlockSpec((1, tb), lambda i: (0, i))

    dims = [D, 32, 64, 128, 64, 32, 1]
    flops = 2 * b_pad * sum(dims[i] * dims[i + 1] for i in range(len(dims) - 1))
    bytes_accessed = (x_t.size * x_t.dtype.itemsize
                      + sum(int(a.size) * a.dtype.itemsize for a in flat)
                      + b_pad * 4)
    cost = pl.CostEstimate(flops=flops, transcendentals=b_pad,
                           bytes_accessed=bytes_accessed)

    out = pl.pallas_call(
        mlp_kernel,
        out_shape=jax.ShapeDtypeStruct((1, b_pad), f32),
        grid=grid,
        in_specs=in_specs,
        out_specs=out_spec,
        compiler_params=pltpu.CompilerParams(
            dimension_semantics=("parallel",)),
        cost_estimate=cost,
    )(x_t, *flat)

    # matches PyTorch out.squeeze(): (B, 1) -> (B,)  (0-d scalar if B == 1)
    return jnp.squeeze(out[0, :B])


def mlp_reference(x, params):
    """Pure-JAX f32 reference of the same forward pass."""
    h = x.astype(jnp.float32)
    for w, b in params[:-1]:
        h = jnp.maximum(h @ w + b, 0.0)
    w, b = params[-1]
    return jnp.squeeze(jax.nn.sigmoid(h @ w + b))


def init_params(key, input_dim):
    """Deterministic init mirroring the nn.Linear shapes (weights stored [in,out])."""
    dims = [input_dim, 32, 64, 128, 64, 32, 1]
    params = []
    for i in range(len(dims) - 1):
        fan_in, fan_out = dims[i], dims[i + 1]
        key, kw, kb = jax.random.split(key, 3)
        bound = 1.0 / jnp.sqrt(fan_in)
        w = jax.random.uniform(kw, (fan_in, fan_out), jnp.float32, -bound, bound)
        b = jax.random.uniform(kb, (1, fan_out), jnp.float32, -bound, bound)
        params.append((w, b))
    return params


if __name__ == "__main__":
    key = jax.random.PRNGKey(0)
    key, kx1, kx2 = jax.random.split(key, 3)

    input_dim = 9                      # small Titanic-style feature vector
    params = init_params(key, input_dim)

    # Small batch (typical Titanic tabular inference).
    x_small = jax.random.normal(kx1, (8, input_dim), jnp.float32)
    # Larger, non-multiple-of-tile batch: exercises the tiled grid + padding.
    x_big = jax.random.normal(kx2, (260, input_dim), jnp.float32)

    ref_small = mlp_reference(x_small, params)
    ref_big = mlp_reference(x_big, params)

    out_f32 = mlp_forward(x_small, params, use_bf16=False)
    out_bf16 = mlp_forward(x_big, params, use_bf16=True)
    jax.block_until_ready((out_f32, out_bf16))

    assert out_f32.shape == (8,)
    assert out_bf16.shape == (260,)
    assert bool(jnp.all((out_bf16 >= 0.0) & (out_bf16 <= 1.0)))
    assert float(jnp.max(jnp.abs(out_f32 - ref_small))) < 2e-2
    assert float(jnp.max(jnp.abs(out_bf16 - ref_big))) < 3e-2

    print("KERNEL_OK")
</pallas_src>

<mosaic_0001>
module attributes {stable_mosaic.version = 11 : i64} {
  func.func @mlp_kernel(%arg0: i32, %arg1: memref<9x128xf32, #tpu.memory_space<vmem>>, %arg2: memref<32x9xf32, #tpu.memory_space<vmem>>, %arg3: memref<32x1xf32, #tpu.memory_space<vmem>>, %arg4: memref<64x32xf32, #tpu.memory_space<vmem>>, %arg5: memref<64x1xf32, #tpu.memory_space<vmem>>, %arg6: memref<128x64xf32, #tpu.memory_space<vmem>>, %arg7: memref<128x1xf32, #tpu.memory_space<vmem>>, %arg8: memref<64x128xf32, #tpu.memory_space<vmem>>, %arg9: memref<64x1xf32, #tpu.memory_space<vmem>>, %arg10: memref<32x64xf32, #tpu.memory_space<vmem>>, %arg11: memref<32x1xf32, #tpu.memory_space<vmem>>, %arg12: memref<1x32xf32, #tpu.memory_space<vmem>>, %arg13: memref<1x1xf32, #tpu.memory_space<vmem>>, %arg14: memref<1x128xf32, #tpu.memory_space<vmem>>) attributes {dimension_semantics = [#tpu.dimension_semantics<parallel>], iteration_bounds = array<i64: 1>, scalar_prefetch = 0 : i64, scratch_operands = 0 : i64, tpu.core_type = #tpu.core_type<tc>, window_params = [{transform_indices = @transform_0, window_bounds = array<i64: 9, 128>}, {pipeline_mode = #tpu.pipeline_mode<synchronous>, transform_indices = @transform_1, window_bounds = array<i64: 32, 9>}, {pipeline_mode = #tpu.pipeline_mode<synchronous>, transform_indices = @transform_2, window_bounds = array<i64: 32, 1>}, {pipeline_mode = #tpu.pipeline_mode<synchronous>, transform_indices = @transform_3, window_bounds = array<i64: 64, 32>}, {pipeline_mode = #tpu.pipeline_mode<synchronous>, transform_indices = @transform_4, window_bounds = array<i64: 64, 1>}, {pipeline_mode = #tpu.pipeline_mode<synchronous>, transform_indices = @transform_5, window_bounds = array<i64: 128, 64>}, {pipeline_mode = #tpu.pipeline_mode<synchronous>, transform_indices = @transform_6, window_bounds = array<i64: 128, 1>}, {pipeline_mode = #tpu.pipeline_mode<synchronous>, transform_indices = @transform_7, window_bounds = array<i64: 64, 128>}, {pipeline_mode = #tpu.pipeline_mode<synchronous>, transform_indices = @transform_8, window_bounds = array<i64: 64, 1>}, {pipeline_mode = #tpu.pipeline_mode<synchronous>, transform_indices = @transform_9, window_bounds = array<i64: 32, 64>}, {pipeline_mode = #tpu.pipeline_mode<synchronous>, transform_indices = @transform_10, window_bounds = array<i64: 32, 1>}, {pipeline_mode = #tpu.pipeline_mode<synchronous>, transform_indices = @transform_11, window_bounds = array<i64: 1, 32>}, {pipeline_mode = #tpu.pipeline_mode<synchronous>, transform_indices = @transform_12, window_bounds = array<i64: 1, 1>}, {transform_indices = @transform_13, window_bounds = array<i64: 1, 128>}]} {
    %c0 = arith.constant 0 : index
    %c0_0 = arith.constant 0 : index
    %0 = vector.load %arg1[%c0, %c0_0] : memref<9x128xf32, #tpu.memory_space<vmem>>, vector<9x128xf32>
    %c0_1 = arith.constant 0 : index
    %c0_2 = arith.constant 0 : index
    %1 = vector.load %arg2[%c0_1, %c0_2] : memref<32x9xf32, #tpu.memory_space<vmem>>, vector<32x9xf32>
    %cst = arith.constant dense<0.000000e+00> : vector<32x128xf32>
    %2 = tpu.matmul %1, %0, %cst {dimension_numbers = #tpu.dot_dimension_numbers<[1], [0], [0], [1], [0, 0, 1, 1], [], []>} : vector<32x9xf32>, vector<9x128xf32>, vector<32x128xf32> -> vector<32x128xf32>
    %c0_3 = arith.constant 0 : index
    %c0_4 = arith.constant 0 : index
    %3 = vector.load %arg3[%c0_3, %c0_4] : memref<32x1xf32, #tpu.memory_space<vmem>>, vector<32x1xf32>
    %4 = vector.broadcast %3 : vector<32x1xf32> to vector<32x128xf32>
    %5 = arith.addf %2, %4 : vector<32x128xf32>
    %cst_5 = arith.constant 0.000000e+00 : f32
    %6 = vector.broadcast %cst_5 : f32 to vector<32x128xf32>
    %7 = arith.maximumf %5, %6 : vector<32x128xf32>
    %c0_6 = arith.constant 0 : index
    %c0_7 = arith.constant 0 : index
    %8 = vector.load %arg4[%c0_6, %c0_7] : memref<64x32xf32, #tpu.memory_space<vmem>>, vector<64x32xf32>
    %cst_8 = arith.constant dense<0.000000e+00> : vector<64x128xf32>
    %9 = tpu.matmul %8, %7, %cst_8 {dimension_numbers = #tpu.dot_dimension_numbers<[1], [0], [0], [1], [0, 0, 1, 1], [], []>} : vector<64x32xf32>, vector<32x128xf32>, vector<64x128xf32> -> vector<64x128xf32>
    %c0_9 = arith.constant 0 : index
    %c0_10 = arith.constant 0 : index
    %10 = vector.load %arg5[%c0_9, %c0_10] : memref<64x1xf32, #tpu.memory_space<vmem>>, vector<64x1xf32>
    %11 = vector.broadcast %10 : vector<64x1xf32> to vector<64x128xf32>
    %12 = arith.addf %9, %11 : vector<64x128xf32>
    %cst_11 = arith.constant 0.000000e+00 : f32
    %13 = vector.broadcast %cst_11 : f32 to vector<64x128xf32>
    %14 = arith.maximumf %12, %13 : vector<64x128xf32>
    %c0_12 = arith.constant 0 : index
    %c0_13 = arith.constant 0 : index
    %15 = vector.load %arg6[%c0_12, %c0_13] : memref<128x64xf32, #tpu.memory_space<vmem>>, vector<128x64xf32>
    %cst_14 = arith.constant dense<0.000000e+00> : vector<128x128xf32>
    %16 = tpu.matmul %15, %14, %cst_14 {dimension_numbers = #tpu.dot_dimension_numbers<[1], [0], [0], [1], [0, 0, 1, 1], [], []>} : vector<128x64xf32>, vector<64x128xf32>, vector<128x128xf32> -> vector<128x128xf32>
    %c0_15 = arith.constant 0 : index
    %c0_16 = arith.constant 0 : index
    %17 = vector.load %arg7[%c0_15, %c0_16] : memref<128x1xf32, #tpu.memory_space<vmem>>, vector<128x1xf32>
    %18 = vector.broadcast %17 : vector<128x1xf32> to vector<128x128xf32>
    %19 = arith.addf %16, %18 : vector<128x128xf32>
    %cst_17 = arith.constant 0.000000e+00 : f32
    %20 = vector.broadcast %cst_17 : f32 to vector<128x128xf32>
    %21 = arith.maximumf %19, %20 : vector<128x128xf32>
    %c0_18 = arith.constant 0 : index
    %c0_19 = arith.constant 0 : index
    %22 = vector.load %arg8[%c0_18, %c0_19] : memref<64x128xf32, #tpu.memory_space<vmem>>, vector<64x128xf32>
    %cst_20 = arith.constant dense<0.000000e+00> : vector<64x128xf32>
    %23 = tpu.matmul %22, %21, %cst_20 {dimension_numbers = #tpu.dot_dimension_numbers<[1], [0], [0], [1], [0, 0, 1, 1], [], []>} : vector<64x128xf32>, vector<128x128xf32>, vector<64x128xf32> -> vector<64x128xf32>
    %c0_21 = arith.constant 0 : index
    %c0_22 = arith.constant 0 : index
    %24 = vector.load %arg9[%c0_21, %c0_22] : memref<64x1xf32, #tpu.memory_space<vmem>>, vector<64x1xf32>
    %25 = vector.broadcast %24 : vector<64x1xf32> to vector<64x128xf32>
    %26 = arith.addf %23, %25 : vector<64x128xf32>
    %cst_23 = arith.constant 0.000000e+00 : f32
    %27 = vector.broadcast %cst_23 : f32 to vector<64x128xf32>
    %28 = arith.maximumf %26, %27 : vector<64x128xf32>
    %c0_24 = arith.constant 0 : index
    %c0_25 = arith.constant 0 : index
    %29 = vector.load %arg10[%c0_24, %c0_25] : memref<32x64xf32, #tpu.memory_space<vmem>>, vector<32x64xf32>
    %cst_26 = arith.constant dense<0.000000e+00> : vector<32x128xf32>
    %30 = tpu.matmul %29, %28, %cst_26 {dimension_numbers = #tpu.dot_dimension_numbers<[1], [0], [0], [1], [0, 0, 1, 1], [], []>} : vector<32x64xf32>, vector<64x128xf32>, vector<32x128xf32> -> vector<32x128xf32>
    %c0_27 = arith.constant 0 : index
    %c0_28 = arith.constant 0 : index
    %31 = vector.load %arg11[%c0_27, %c0_28] : memref<32x1xf32, #tpu.memory_space<vmem>>, vector<32x1xf32>
    %32 = vector.broadcast %31 : vector<32x1xf32> to vector<32x128xf32>
    %33 = arith.addf %30, %32 : vector<32x128xf32>
    %cst_29 = arith.constant 0.000000e+00 : f32
    %34 = vector.broadcast %cst_29 : f32 to vector<32x128xf32>
    %35 = arith.maximumf %33, %34 : vector<32x128xf32>
    %c0_30 = arith.constant 0 : index
    %c0_31 = arith.constant 0 : index
    %36 = vector.load %arg12[%c0_30, %c0_31] : memref<1x32xf32, #tpu.memory_space<vmem>>, vector<1x32xf32>
    %cst_32 = arith.constant dense<0.000000e+00> : vector<1x128xf32>
    %37 = tpu.matmul %36, %35, %cst_32 {dimension_numbers = #tpu.dot_dimension_numbers<[1], [0], [0], [1], [0, 0, 1, 1], [], []>} : vector<1x32xf32>, vector<32x128xf32>, vector<1x128xf32> -> vector<1x128xf32>
    %c0_33 = arith.constant 0 : index
    %c0_34 = arith.constant 0 : index
    %38 = vector.load %arg13[%c0_33, %c0_34] : memref<1x1xf32, #tpu.memory_space<vmem>>, vector<1x1xf32>
    %39 = vector.broadcast %38 : vector<1x1xf32> to vector<1x128xf32>
    %40 = arith.addf %37, %39 : vector<1x128xf32>
    %41 = arith.negf %40 : vector<1x128xf32>
    %42 = math.exp %41 : vector<1x128xf32>
    %cst_35 = arith.constant 1.000000e+00 : f32
    %43 = vector.broadcast %cst_35 : f32 to vector<1x128xf32>
    %44 = arith.addf %43, %42 : vector<1x128xf32>
    %45 = arith.divf %43, %44 : vector<1x128xf32>
    %c0_36 = arith.constant 0 : index
    %c0_37 = arith.constant 0 : index
    %46 = vector.load %arg14[%c0_36, %c0_37] : memref<1x128xf32, #tpu.memory_space<vmem>>, vector<1x128xf32>
    tpu.vector_store %arg14[%c0_36, %c0_37], %45 {strides = array<i32>} : memref<1x128xf32, #tpu.memory_space<vmem>>, vector<1x128xf32>,
    return
  }
  func.func @transform_0(%arg0: i32) -> (i32, i32) {
    %c0_i32 = arith.constant 0 : i32
    %c0_i32_0 = arith.constant 0 : i32
    return %c0_i32, %arg0 : i32, i32
  }
  func.func @transform_1(%arg0: i32) -> (i32, i32) {
    %c0_i32 = arith.constant 0 : i32
    %c0_i32_0 = arith.constant 0 : i32
    %c0_i32_1 = arith.constant 0 : i32
    return %c0_i32, %c0_i32_0 : i32, i32
  }
  func.func @transform_2(%arg0: i32) -> (i32, i32) {
    %c0_i32 = arith.constant 0 : i32
    %c0_i32_0 = arith.constant 0 : i32
    %c0_i32_1 = arith.constant 0 : i32
    return %c0_i32, %c0_i32_0 : i32, i32
  }
  func.func @transform_3(%arg0: i32) -> (i32, i32) {
    %c0_i32 = arith.constant 0 : i32
    %c0_i32_0 = arith.constant 0 : i32
    %c0_i32_1 = arith.constant 0 : i32
    return %c0_i32, %c0_i32_0 : i32, i32
  }
  func.func @transform_4(%arg0: i32) -> (i32, i32) {
    %c0_i32 = arith.constant 0 : i32
    %c0_i32_0 = arith.constant 0 : i32
    %c0_i32_1 = arith.constant 0 : i32
    return %c0_i32, %c0_i32_0 : i32, i32
  }
  func.func @transform_5(%arg0: i32) -> (i32, i32) {
    %c0_i32 = arith.constant 0 : i32
    %c0_i32_0 = arith.constant 0 : i32
    %c0_i32_1 = arith.constant 0 : i32
    return %c0_i32, %c0_i32_0 : i32, i32
  }
  func.func @transform_6(%arg0: i32) -> (i32, i32) {
    %c0_i32 = arith.constant 0 : i32
    %c0_i32_0 = arith.constant 0 : i32
    %c0_i32_1 = arith.constant 0 : i32
    return %c0_i32, %c0_i32_0 : i32, i32
  }
  func.func @transform_7(%arg0: i32) -> (i32, i32) {
    %c0_i32 = arith.constant 0 : i32
    %c0_i32_0 = arith.constant 0 : i32
    %c0_i32_1 = arith.constant 0 : i32
    return %c0_i32, %c0_i32_0 : i32, i32
  }
  func.func @transform_8(%arg0: i32) -> (i32, i32) {
    %c0_i32 = arith.constant 0 : i32
    %c0_i32_0 = arith.constant 0 : i32
    %c0_i32_1 = arith.constant 0 : i32
    return %c0_i32, %c0_i32_0 : i32, i32
  }
  func.func @transform_9(%arg0: i32) -> (i32, i32) {
    %c0_i32 = arith.constant 0 : i32
    %c0_i32_0 = arith.constant 0 : i32
    %c0_i32_1 = arith.constant 0 : i32
    return %c0_i32, %c0_i32_0 : i32, i32
  }
  func.func @transform_10(%arg0: i32) -> (i32, i32) {
    %c0_i32 = arith.constant 0 : i32
    %c0_i32_0 = arith.constant 0 : i32
    %c0_i32_1 = arith.constant 0 : i32
    return %c0_i32, %c0_i32_0 : i32, i32
  }
  func.func @transform_11(%arg0: i32) -> (i32, i32) {
    %c0_i32 = arith.constant 0 : i32
    %c0_i32_0 = arith.constant 0 : i32
    %c0_i32_1 = arith.constant 0 : i32
    return %c0_i32, %c0_i32_0 : i32, i32
  }
  func.func @transform_12(%arg0: i32) -> (i32, i32) {
    %c0_i32 = arith.constant 0 : i32
    %c0_i32_0 = arith.constant 0 : i32
    %c0_i32_1 = arith.constant 0 : i32
    return %c0_i32, %c0_i32_0 : i32, i32
  }
  func.func @transform_13(%arg0: i32) -> (i32, i32) {
    %c0_i32 = arith.constant 0 : i32
    %c0_i32_0 = arith.constant 0 : i32
    return %c0_i32, %arg0 : i32, i32
  }
}

</mosaic_0001>

<bundles_post_ra>
// kernel: tpu_custom_call.1
= control target key start
LH: loop header
LB: loop body
LE: loop exit
PB: predicated region body
PF: predicated region fallthrough
CT: control target
= control target key end

     0   :  { %s1192_s0 = inlined_call_operand.vmem [shape: f32[9,128], index: 0, kind: input, shape index: {}]   ;;  %s1193_s1 = inlined_call_operand.vmem [shape: f32[32,9], index: 1, kind: input, shape index: {}]   ;;  %s1194_s2 = inlined_call_operand.vmem [shape: f32[32,1], index: 2, kind: input, shape index: {}]   ;;  %s1195_s3 = inlined_call_operand.vmem [shape: f32[64,32], index: 3, kind: input, shape index: {}]   ;;  %s1196_s4 = inlined_call_operand.vmem [shape: f32[64,1], index: 4, kind: input, shape index: {}]   ;;  %s1197_s5 = inlined_call_operand.vmem [shape: f32[128,64], index: 5, kind: input, shape index: {}]   ;;  %s1198_s6 = inlined_call_operand.vmem [shape: f32[128,1], index: 6, kind: input, shape index: {}]   ;;  %s1199_s7 = inlined_call_operand.vmem [shape: f32[64,128], index: 7, kind: input, shape index: {}]   ;;  %s1200_s8 = inlined_call_operand.vmem [shape: f32[64,1], index: 8, kind: input, shape index: {}]   ;;  %s1201_s9 = inlined_call_operand.vmem [shape: f32[32,64], index: 9, kind: input, shape index: {}]   ;;  %s1202_s10 = inlined_call_operand.vmem [shape: f32[32,1], index: 10, kind: input, shape index: {}]   ;;  %s1203_s11 = inlined_call_operand.vmem [shape: f32[1,32], index: 11, kind: input, shape index: {}]   ;;  %s1204_s12 = inlined_call_operand.<no memory space> [shape: f32[1,1], index: 12, kind: input, shape index: {}]   ;;  %s1205_s13 = inlined_call_operand.hbm [shape: f32[1,128], index: 13, kind: output, shape index: {}]  }
   0x1   :  { %v18_v0 = vstv %s1204_s12 }
   0x2   :  { %19 = vst [vmem:[#allocation2] sm:$0x1] %v18_v0 }
   0x3   :  { %v48_v1 = vld [vmem:[%s1192_s0 + $0x8] sm:$0x1]  ;;  %vm90_vm0 = vcmask 1040384   ;;  %v56_v2 = vld [vmem:[%s1194_s2 + $0x18] sm:$0xff]  ;;  %v832_v4 = vmov 0   ;;  %v47_v5 = vld [vmem:[%s1192_s0] sm:$0xff] }
   0x4   :  { %v54_v3 = vld [vmem:[%s1194_s2 + $0x8] sm:$0xff]  ;;  %800 = vset.pattern.permute.xlu1 %v832_v4  ;;  %799 = vset.pattern.permute.xlu0 %v832_v4  ;;  %v49_v6 = vld [vmem:[%s1193_s1] sm:$0xff]  ;;  %vm77_vm1 = vcmask 72704   ;;  %v51_v7 = vld [vmem:[%s1193_s1 + $0x10] sm:$0xff] }
   0x5   :  { %744 = vmatpush.msk.msra.mxu0 %vm90_vm0, %v48_v1  ;;  %779 = vmatpush.msk.msra.mxu1 %vm90_vm0, %v48_v1 }
   0x6   :  { %74 = vperm.xlu0 %799, %v56_v2   ;;  %64 = vperm.xlu1 %800, %v54_v3  }
   0x7   :  { %109 = vmatpush.msra.mxu0 %v47_v5  ;;  %780 = vmatpush.msra.mxu1 %v47_v5 }
   0x8   :  { %745 = vmatmul.msk.f32.vlgmr.msra.gmra.mxu0 %vm77_vm1, %v49_v6  ;;  %747 = vmatmul.msk.f32.vlgmr.msra.gmra.mxu1 %vm77_vm1, %v51_v7 }
   0x9   :  { %20 = vsyncpa [#allocation4], 0  ;;  %801 = vset.pattern.permute.xlu2 %v832_v4  ;;  %v55_v8 = vld [vmem:[%s1194_s2 + $0x10] sm:$0xff]  ;;  %v53_v9 = vld [vmem:[%s1194_s2] sm:$0xff]  ;;  %vm183_vm2 = vcmask 261120   ;;  %vm369_vm3 = vcmask 523264  }
   0xa   :  { %v50_v10 = vld [vmem:[%s1193_s1 + $0x8] sm:$0xff]  ;;  %v52_v11 = vld [vmem:[%s1193_s1 + $0x18] sm:$0xff]  ;;  %v139_v13 = vld [vmem:[%s1196_s4 + $0x20] sm:$0xff] }
   0xb   :  { %v140_v12 = vld [vmem:[%s1196_s4 + $0x28] sm:$0xff]  ;;  %v137_v14 = vld [vmem:[%s1196_s4 + $0x10] sm:$0xff]  ;;  %v288_v16 = vld [vmem:[%s1198_s6 + $0x78] sm:$0xff] }
   0xc   :  { %v136_v15 = vld [vmem:[%s1196_s4 + $0x8] sm:$0xff]  ;;  %v287_v17 = vld [vmem:[%s1198_s6 + $0x70] sm:$0xff]  ;;  %v285_v18 = vld [vmem:[%s1198_s6 + $0x60] sm:$0xff] }
   0xd   :  { %v284_v19 = vld [vmem:[%s1198_s6 + $0x58] sm:$0xff]  ;;  %v282_v20 = vld [vmem:[%s1198_s6 + $0x48] sm:$0xff]  ;;  %v281_v21 = vld [vmem:[%s1198_s6 + $0x40] sm:$0xff] }
   0xe   :  { %69 = vperm.xlu0 %799, %v55_v8   ;;  %59 = vperm.xlu1 %800, %v53_v9   ;;  %v279_v22 = vld [vmem:[%s1198_s6 + $0x30] sm:$0xff]  ;;  %v278_v23 = vld [vmem:[%s1198_s6 + $0x28] sm:$0xff]  ;;  %v276_v24 = vld [vmem:[%s1198_s6 + $0x18] sm:$0xff] }
   0xf   :  { %v275_v25 = vld [vmem:[%s1198_s6 + $0x10] sm:$0xff]  ;;  %v273_v26 = vld [vmem:[%s1198_s6] sm:$0xff]  ;;  %v514_v27 = vld [vmem:[%s1200_s8 + $0x38] sm:$0xff] }
  0x10   :  { %746 = vmatmul.msk.f32.gmra.mxu0 %vm77_vm1, %v50_v10  ;;  %748 = vmatmul.msk.f32.gmra.mxu1 %vm77_vm1, %v52_v11  ;;  %v512_v28 = vld [vmem:[%s1200_s8 + $0x28] sm:$0xff]  ;;  %v511_v29 = vld [vmem:[%s1200_s8 + $0x20] sm:$0xff]  ;;  %v509_v30 = vld [vmem:[%s1200_s8 + $0x10] sm:$0xff] }
  0x11   :  { %v508_v31 = vld [vmem:[%s1200_s8 + $0x8] sm:$0xff]  ;;  %v611_v32 = vld [vmem:[%s1202_s10 + $0x18] sm:$0xff]  ;;  %v610_v33 = vld [vmem:[%s1202_s10 + $0x10] sm:$0xff] }
  0x12   :  { %v142_v34 = vld [vmem:[%s1196_s4 + $0x38] sm:$0xff]  ;;  %v608_v35 = vld [vmem:[%s1202_s10] sm:$0xff]  ;;  %v141_v37 = vld [vmem:[%s1196_s4 + $0x30] sm:$0xff] }
  0x13   :  { %180 = vperm.xlu2 %801, %v142_v34   ;;  %v678_v36 = vld [vmem:[#allocation2] sm:$0x1]  ;;  %v138_v38 = vld [vmem:[%s1196_s4 + $0x18] sm:$0xff]  ;;  %v286_v44 = vld [vmem:[%s1198_s6 + $0x68] sm:$0xff] }
  0x14   :  { %v135_v39 = vld [vmem:[%s1196_s4] sm:$0xff]  ;;  %v283_v53 = vld [vmem:[%s1198_s6 + $0x50] sm:$0xff]  ;;  %v280_v59 = vld [vmem:[%s1198_s6 + $0x38] sm:$0xff] }
  0x15   :  { %v127_v58 = vld [vmem:[%s1195_s3] sm:$0xff]  ;;  %v128_v60 = vld [vmem:[%s1195_s3 + $0x8] sm:$0xff]  ;;  %v129_v62 = vld [vmem:[%s1195_s3 + $0x10] sm:$0xff] }
  0x16   :  { %170 = vperm.xlu0 %799, %v140_v12   ;;  %165 = vperm.xlu1 %800, %v139_v13   ;;  %v277_v61 = vld [vmem:[%s1198_s6 + $0x20] sm:$0xff]  ;;  %v274_v63 = vld [vmem:[%s1198_s6 + $0x8] sm:$0xff]  ;;  %v130_v0 = vld [vmem:[%s1195_s3 + $0x18] sm:$0xff] }
  0x17   :  { %v513_v1 = vld [vmem:[%s1200_s8 + $0x30] sm:$0xff]  ;;  %v131_v2 = vld [vmem:[%s1195_s3 + $0x20] sm:$0xff]  ;;  %v510_v3 = vld [vmem:[%s1200_s8 + $0x18] sm:$0xff] }
  0x18   :  { %v132_v4 = vld [vmem:[%s1195_s3 + $0x28] sm:$0xff]  ;;  %v507_v5 = vld [vmem:[%s1200_s8] sm:$0xff]  ;;  %v133_v6 = vld [vmem:[%s1195_s3 + $0x30] sm:$0xff] }
  0x19   :  { %v609_v7 = vld [vmem:[%s1202_s10 + $0x8] sm:$0xff]  ;;  %v134_v8 = vld [vmem:[%s1195_s3 + $0x38] sm:$0xff] }
  0x1b   :  { %175 = vperm.xlu2 %801, %v141_v37  }
  0x1e   :  { %155 = vperm.xlu0 %799, %v137_v14   ;;  %150 = vperm.xlu1 %800, %v136_v15  }
  0x23   :  { %160 = vperm.xlu2 %801, %v138_v38  }
  0x26   :  { %366 = vperm.xlu0 %799, %v288_v16   ;;  %361 = vperm.xlu1 %800, %v287_v17  }
  0x2b   :  { %145 = vperm.xlu2 %801, %v135_v39  }
  0x2e   :  { %351 = vperm.xlu0 %799, %v285_v18   ;;  %346 = vperm.xlu1 %800, %v284_v19  }
  0x33   :  { %356 = vperm.xlu2 %801, %v286_v44   ;;  %v258_v44 = vld [vmem:[%s1197_s5 + $0x8] sm:$0xff] }
  0x36   :  { %336 = vperm.xlu0 %799, %v282_v20   ;;  %331 = vperm.xlu1 %800, %v281_v21  }
  0x3b   :  { %341 = vperm.xlu2 %801, %v283_v53   ;;  %v269_v53 = vld [vmem:[%s1197_s5 + $0x60] sm:$0xff] }
  0x3e   :  { %321 = vperm.xlu0 %799, %v279_v22   ;;  %316 = vperm.xlu1 %800, %v278_v23  }
  0x43   :  { %326 = vperm.xlu2 %801, %v280_v59  }
  0x46   :  { %306 = vperm.xlu0 %799, %v276_v24   ;;  %301 = vperm.xlu1 %800, %v275_v25  }
  0x4b   :  { %311 = vperm.xlu2 %801, %v277_v61  }
  0x4e   :  { %291 = vperm.xlu0 %799, %v273_v26   ;;  %552 = vperm.xlu1 %800, %v514_v27  }
  0x53   :  { %296 = vperm.xlu2 %801, %v274_v63  }
  0x56   :  { %542 = vperm.xlu0 %799, %v512_v28   ;;  %537 = vperm.xlu1 %800, %v511_v29  }
  0x5b   :  { %547 = vperm.xlu2 %801, %v513_v1  }
  0x5e   :  { %527 = vperm.xlu0 %799, %v509_v30   ;;  %522 = vperm.xlu1 %800, %v508_v31  }
  0x63   :  { %532 = vperm.xlu2 %801, %v510_v3  }
  0x66   :  { %629 = vperm.xlu0 %799, %v611_v32   ;;  %624 = vperm.xlu1 %800, %v610_v33  }
  0x6b   :  { %517 = vperm.xlu2 %801, %v507_v5  }
  0x6d   :  { %v181_v14 = vpop.permute.xlu2 %180 }
  0x6e   :  { %614 = vperm.xlu0 %799, %v608_v35   ;;  %681 = vperm.xlu1 %800, %v678_v36  }
  0x73   :  { %619 = vperm.xlu2 %801, %v609_v7  }
  0x75   :  { %v176_v16 = vpop.permute.xlu2 %175 }
  0x78   :  { %v75_v40 = vpop.permute.xlu0 %74  ;;  %v65_v43 = vpop.permute.xlu1 %64 }
  0x7d   :  { %v161_v23 = vpop.permute.xlu2 %160 }
  0x80   :  { %v70_v45 = vpop.permute.xlu0 %69  ;;  %v60_v52 = vpop.permute.xlu1 %59 }
  0x85   :  { %v111_v41 = vpop.f32.mrf.mxu0  ;;  %v117_v42 = vpop.f32.mrf.mxu1 }
  0x86   :  { %v118_v48 = vadd.f32 %v117_v42, %v70_v45  ;;  %v112_v54 = vadd.f32 %v111_v41, %v60_v52  ;;  %v146_v36 = vpop.permute.xlu2 %145  ;;  %v257_v41 = vld [vmem:[%s1197_s5] sm:$0xff]  ;;  %v263_v45 = vld [vmem:[%s1197_s5 + $0x30] sm:$0xff]  ;;  %v268_v52 = vld [vmem:[%s1197_s5 + $0x58] sm:$0xff] }
  0x87   :  { %v261_v42 = vld [vmem:[%s1197_s5 + $0x20] sm:$0xff] }
  0x88   :  { %v125_v55 = vmax.f32 %v118_v48, 0.0  ;;  %v123_v57 = vmax.f32 %v112_v54, 0.0  ;;  %v171_v18 = vpop.permute.xlu0 %170  ;;  %v166_v19 = vpop.permute.xlu1 %165  ;;  %v260_v48 = vld [vmem:[%s1197_s5 + $0x18] sm:$0xff]  ;;  %v270_v54 = vld [vmem:[%s1197_s5 + $0x68] sm:$0xff] }
  0x8d   :  { %v114_v46 = vpop.f32.mrf.mxu0  ;;  %v120_v47 = vpop.f32.mrf.mxu1 }
  0x8e   :  { %v121_v49 = vadd.f32 %v120_v47, %v75_v40  ;;  %v115_v50 = vadd.f32 %v114_v46, %v65_v43  ;;  %v262_v43 = vld [vmem:[%s1197_s5 + $0x28] sm:$0xff]  ;;  %v259_v46 = vld [vmem:[%s1197_s5 + $0x10] sm:$0xff]  ;;  %v264_v47 = vld [vmem:[%s1197_s5 + $0x38] sm:$0xff] }
  0x90   :  { %v126_v51 = vmax.f32 %v121_v49, 0.0  ;;  %v124_v56 = vmax.f32 %v115_v50, 0.0  ;;  %v156_v30 = vpop.permute.xlu0 %155  ;;  %v151_v33 = vpop.permute.xlu1 %150  ;;  %v265_v49 = vld [vmem:[%s1197_s5 + $0x40] sm:$0xff]  ;;  %v266_v50 = vld [vmem:[%s1197_s5 + $0x48] sm:$0xff] }
  0x92   :  { %220 = vmatpush.msrb.mxu1 %v126_v51  ;;  %v267_v51 = vld [vmem:[%s1197_s5 + $0x50] sm:$0xff] }
  0x94   :  { %221 = vmatpush.msrb.mxu1 %v125_v55  ;;  %v271_v55 = vld [vmem:[%s1197_s5 + $0x70] sm:$0xff] }
  0x96   :  { %222 = vmatpush.msrb.mxu1 %v124_v56  ;;  %v272_v56 = vld [vmem:[%s1197_s5 + $0x78] sm:$0xff]  ;;  %s735_s5 = sshll.u32 %s1205_s13, 4  ;;  %s736_s5 = int_to_ptr.hbm [resolvable:$true] %s735_s5 }
  0x98   :  { %223 = vmatpush.msrb.mxu1 %v123_v57  ;;  %v367_v1 = vpop.permute.xlu0 %366 }
  0x99   :  { %749 = vmatmul.msk.f32.vlgmr.msrb.gmra.mxu1 %vm183_vm2, %v127_v58 }
  0xa0   :  { %v352_v5 = vpop.permute.xlu0 %351 }
  0xa1   :  { %750 = vmatmul.msk.f32.gmra.mxu1 %vm183_vm2, %v128_v60 }
  0xa9   :  { %751 = vmatmul.msk.f32.gmra.mxu1 %vm183_vm2, %v129_v62 }
  0xb1   :  { %752 = vmatmul.msk.f32.gmra.mxu1 %vm183_vm2, %v130_v0 }
  0xb9   :  { %753 = vmatmul.msk.f32.gmra.mxu1 %vm183_vm2, %v131_v2  ;;  %v362_v2 = vpop.permute.xlu1 %361 }
  0xc1   :  { %754 = vmatmul.msk.f32.gmra.mxu1 %vm183_vm2, %v132_v4  ;;  %v357_v4 = vpop.permute.xlu2 %356 }
  0xc9   :  { %755 = vmatmul.msk.f32.gmra.mxu1 %vm183_vm2, %v133_v6 }
  0xd1   :  { %756 = vmatmul.msk.f32.gmra.mxu1 %vm183_vm2, %v134_v8  ;;  %v347_v8 = vpop.permute.xlu1 %346 }
 0x116   :  { %v225_v9 = vpop.f32.mrf.mxu1 }
 0x117   :  { %v226_v37 = vadd.f32 %v225_v9, %v146_v36  ;;  %v342_v9 = vpop.permute.xlu2 %341 }
 0x119   :  { %v249_v40 = vmax.f32 %v226_v37, 0.0 }
 0x11e   :  { %v228_v10 = vpop.f32.mrf.mxu1 }
 0x11f   :  { %v229_v34 = vadd.f32 %v228_v10, %v151_v33  ;;  %v337_v10 = vpop.permute.xlu0 %336 }
 0x121   :  { %v250_v39 = vmax.f32 %v229_v34, 0.0 }
 0x126   :  { %v231_v11 = vpop.f32.mrf.mxu1 }
 0x127   :  { %v232_v31 = vadd.f32 %v231_v11, %v156_v30 }
 0x129   :  { %v251_v38 = vmax.f32 %v232_v31, 0.0 }
 0x12e   :  { %v234_v12 = vpop.f32.mrf.mxu1 }
 0x12f   :  { %v235_v28 = vadd.f32 %v234_v12, %v161_v23  ;;  %v322_v23 = vpop.permute.xlu0 %321 }
 0x131   :  { %v252_v35 = vmax.f32 %v235_v28, 0.0 }
 0x136   :  { %v237_v13 = vpop.f32.mrf.mxu1 }
 0x137   :  { %v238_v26 = vadd.f32 %v237_v13, %v166_v19  ;;  %v307_v37 = vpop.permute.xlu0 %306 }
 0x139   :  { %v253_v32 = vmax.f32 %v238_v26, 0.0 }
 0x13e   :  { %v240_v15 = vpop.f32.mrf.mxu1 }
 0x13f   :  { %v241_v24 = vadd.f32 %v240_v15, %v171_v18 }
 0x141   :  { %v254_v29 = vmax.f32 %v241_v24, 0.0 }
 0x146   :  { %v243_v17 = vpop.f32.mrf.mxu1 }
 0x147   :  { %v244_v21 = vadd.f32 %v243_v17, %v176_v16  ;;  %v332_v17 = vpop.permute.xlu1 %331 }
 0x149   :  { %v255_v27 = vmax.f32 %v244_v21, 0.0 }
 0x14e   :  { %v246_v20 = vpop.f32.mrf.mxu1 }
 0x14f   :  { %v247_v22 = vadd.f32 %v246_v20, %v181_v14  ;;  %v327_v20 = vpop.permute.xlu2 %326  ;;  %v317_v31 = vpop.permute.xlu1 %316 }
 0x151   :  { %v256_v25 = vmax.f32 %v247_v22, 0.0 }
 0x153   :  { %426 = vmatpush.msrb.mxu0 %v256_v25  ;;  %781 = vmatpush.msra.mxu1 %v256_v25 }
 0x154   :  { %782 = vmatpush.msra.mxu2 %v256_v25 }
 0x155   :  { %427 = vmatpush.msrb.mxu0 %v255_v27  ;;  %783 = vmatpush.msra.mxu1 %v255_v27 }
 0x156   :  { %784 = vmatpush.msra.mxu2 %v255_v27 }
 0x157   :  { %428 = vmatpush.msrb.mxu0 %v254_v29  ;;  %785 = vmatpush.msra.mxu1 %v254_v29  ;;  %v312_v34 = vpop.permute.xlu2 %311 }
 0x158   :  { %786 = vmatpush.msra.mxu2 %v254_v29 }
 0x159   :  { %429 = vmatpush.msrb.mxu0 %v253_v32  ;;  %787 = vmatpush.msra.mxu1 %v253_v32 }
 0x15a   :  { %788 = vmatpush.msra.mxu2 %v253_v32 }
 0x15b   :  { %430 = vmatpush.msrb.mxu0 %v252_v35  ;;  %789 = vmatpush.msra.mxu1 %v252_v35 }
 0x15c   :  { %790 = vmatpush.msra.mxu2 %v252_v35 }
 0x15d   :  { %431 = vmatpush.msrb.mxu0 %v251_v38  ;;  %791 = vmatpush.msra.mxu1 %v251_v38 }
 0x15e   :  { %792 = vmatpush.msra.mxu2 %v251_v38 }
 0x15f   :  { %432 = vmatpush.msrb.mxu0 %v250_v39  ;;  %793 = vmatpush.msra.mxu1 %v250_v39 }
 0x160   :  { %794 = vmatpush.msra.mxu2 %v250_v39 }
 0x161   :  { %433 = vmatpush.msrb.mxu0 %v249_v40  ;;  %795 = vmatpush.msra.mxu1 %v249_v40 }
 0x162   :  { %796 = vmatpush.msra.mxu2 %v249_v40  ;;  %757 = vmatmul.msk.f32.vlgmr.msrb.gmra.mxu0 %vm369_vm3, %v257_v41 }
 0x163   :  { %761 = vmatmul.msk.f32.vlgmr.msra.gmra.mxu1 %vm369_vm3, %v261_v42  ;;  %762 = vmatmul.msk.f32.vlgmr.msra.gmra.mxu2 %vm369_vm3, %v262_v43 }
 0x16a   :  { %758 = vmatmul.msk.f32.gmra.mxu0 %vm369_vm3, %v258_v44 }
 0x16b   :  { %763 = vmatmul.msk.f32.gmra.mxu2 %vm369_vm3, %v263_v45 }
 0x172   :  { %759 = vmatmul.msk.f32.gmra.mxu0 %vm369_vm3, %v259_v46  ;;  %v302_v46 = vpop.permute.xlu1 %301 }
 0x173   :  { %764 = vmatmul.msk.f32.gmra.mxu2 %vm369_vm3, %v264_v47 }
 0x17a   :  { %760 = vmatmul.msk.f32.gmra.mxu0 %vm369_vm3, %v260_v48 }
 0x17b   :  { %765 = vmatmul.msk.f32.gmra.mxu2 %vm369_vm3, %v265_v49  ;;  %v297_v49 = vpop.permute.xlu2 %296 }
 0x183   :  { %766 = vmatmul.msk.f32.gmra.mxu2 %vm369_vm3, %v266_v50 }
 0x18b   :  { %767 = vmatmul.msk.f32.gmra.mxu2 %vm369_vm3, %v267_v51 }
 0x193   :  { %768 = vmatmul.msk.f32.gmra.mxu2 %vm369_vm3, %v268_v52  ;;  %v292_v52 = vpop.permute.xlu0 %291 }
 0x19b   :  { %769 = vmatmul.msk.f32.gmra.mxu2 %vm369_vm3, %v269_v53 }
 0x1a3   :  { %770 = vmatmul.msk.f32.gmra.mxu2 %vm369_vm3, %v270_v54 }
 0x1ab   :  { %771 = vmatmul.msk.f32.gmra.mxu2 %vm369_vm3, %v271_v55 }
 0x1b3   :  { %772 = vmatmul.msk.f32.gmra.mxu2 %vm369_vm3, %v272_v56 }
 0x1df   :  { %v435_v6 = vpop.f32.mrf.mxu0 }
 0x1e0   :  { %v447_v38 = vpop.f32.mrf.mxu1  ;;  %v436_v53 = vadd.f32 %v435_v6, %v292_v52 }
 0x1e1   :  { %v448_v42 = vadd.f32 %v447_v38, %v312_v34  ;;  %v605_v34 = vld [vmem:[%s1201_s9 + $0x8] sm:$0xff] }
 0x1e2   :  { %v483_v56 = vmax.f32 %v436_v53, 0.0  ;;  %v677_v53 = vld [vmem:[%s1203_s11] sm:$0x1]  ;;  %s833_s11 = smov [#allocation3]  }
 0x1e3   :  { %v487_v47 = vmax.f32 %v448_v42, 0.0  ;;  %s733_s29 = sshll.u32 %s833_s11, 4  ;;  %s734_s29 = int_to_ptr.vmem [resolvable:$true] %s733_s29 }
 0x1e6   :  { %v450_v57 = vpop.f32.mrf.mxu2 }
 0x1e7   :  { %v438_v11 = vpop.f32.mrf.mxu0  ;;  %v451_v39 = vadd.f32 %v450_v57, %v317_v31  ;;  %v499_v57 = vld [vmem:[%s1199_s7] sm:$0xff] }
 0x1e8   :  { %v439_v50 = vadd.f32 %v438_v11, %v297_v49 }
 0x1e9   :  { %v488_v44 = vmax.f32 %v451_v39, 0.0 }
 0x1ea   :  { %v484_v55 = vmax.f32 %v439_v50, 0.0 }
 0x1ee   :  { %v453_v58 = vpop.f32.mrf.mxu2 }
 0x1ef   :  { %v441_v26 = vpop.f32.mrf.mxu0  ;;  %v454_v35 = vadd.f32 %v453_v58, %v322_v23  ;;  %v500_v58 = vld [vmem:[%s1199_s7 + $0x8] sm:$0xff] }
 0x1f0   :  { %v442_v48 = vadd.f32 %v441_v26, %v302_v46 }
 0x1f1   :  { %v489_v43 = vmax.f32 %v454_v35, 0.0  ;;  %v606_v35 = vld [vmem:[%s1201_s9 + $0x10] sm:$0xff] }
 0x1f2   :  { %v485_v54 = vmax.f32 %v442_v48, 0.0 }
 0x1f6   :  { %v456_v59 = vpop.f32.mrf.mxu2 }
 0x1f7   :  { %v457_v32 = vadd.f32 %v456_v59, %v327_v20  ;;  %v444_v41 = vpop.f32.mrf.mxu0  ;;  %v501_v59 = vld [vmem:[%s1199_s7 + $0x10] sm:$0xff] }
 0x1f8   :  { %v445_v45 = vadd.f32 %v444_v41, %v307_v37 }
 0x1f9   :  { %v490_v40 = vmax.f32 %v457_v32, 0.0 }
 0x1fa   :  { %v486_v51 = vmax.f32 %v445_v45, 0.0 }
 0x1fe   :  { %v459_v60 = vpop.f32.mrf.mxu2 }
 0x1ff   :  { %v460_v29 = vadd.f32 %v459_v60, %v332_v17  ;;  %v502_v60 = vld [vmem:[%s1199_s7 + $0x18] sm:$0xff] }
 0x201   :  { %v491_v36 = vmax.f32 %v460_v29, 0.0 }
 0x206   :  { %v462_v61 = vpop.f32.mrf.mxu2 }
 0x207   :  { %v463_v27 = vadd.f32 %v462_v61, %v337_v10  ;;  %v503_v61 = vld [vmem:[%s1199_s7 + $0x20] sm:$0xff]  ;;  %v543_v10 = vpop.permute.xlu0 %542 }
 0x209   :  { %v492_v33 = vmax.f32 %v463_v27, 0.0 }
 0x20e   :  { %v465_v62 = vpop.f32.mrf.mxu2 }
 0x20f   :  { %v466_v24 = vadd.f32 %v465_v62, %v342_v9  ;;  %v504_v62 = vld [vmem:[%s1199_s7 + $0x28] sm:$0xff] }
 0x211   :  { %v493_v30 = vmax.f32 %v466_v24, 0.0 }
 0x216   :  { %v468_v63 = vpop.f32.mrf.mxu2 }
 0x217   :  { %v469_v21 = vadd.f32 %v468_v63, %v347_v8  ;;  %v505_v63 = vld [vmem:[%s1199_s7 + $0x30] sm:$0xff]  ;;  %v548_v8 = vpop.permute.xlu2 %547 }
 0x219   :  { %v494_v28 = vmax.f32 %v469_v21, 0.0 }
 0x21e   :  { %v471_v0 = vpop.f32.mrf.mxu2 }
 0x21f   :  { %v472_v18 = vadd.f32 %v471_v0, %v352_v5  ;;  %v506_v0 = vld [vmem:[%s1199_s7 + $0x38] sm:$0xff] }
 0x221   :  { %v495_v25 = vmax.f32 %v472_v18, 0.0 }
 0x226   :  { %v474_v3 = vpop.f32.mrf.mxu2 }
 0x227   :  { %v475_v15 = vadd.f32 %v474_v3, %v357_v4 }
 0x229   :  { %v496_v22 = vmax.f32 %v475_v15, 0.0  ;;  %v533_v15 = vpop.permute.xlu2 %532 }
 0x22e   :  { %v477_v7 = vpop.f32.mrf.mxu2 }
 0x22f   :  { %v478_v13 = vadd.f32 %v477_v7, %v362_v2  ;;  %v553_v7 = vpop.permute.xlu1 %552 }
 0x231   :  { %v497_v19 = vmax.f32 %v478_v13, 0.0 }
 0x236   :  { %v480_v12 = vpop.f32.mrf.mxu2 }
 0x237   :  { %v481_v14 = vadd.f32 %v480_v12, %v367_v1  ;;  %v538_v11 = vpop.permute.xlu1 %537 }
 0x239   :  { %v498_v16 = vmax.f32 %v481_v14, 0.0 }
 0x23b   :  { %555 = vmatpush.msra.mxu3 %v498_v16 }
 0x23d   :  { %556 = vmatpush.msra.mxu3 %v497_v19 }
 0x23f   :  { %557 = vmatpush.msra.mxu3 %v496_v22  ;;  %v528_v22 = vpop.permute.xlu0 %527 }
 0x241   :  { %558 = vmatpush.msra.mxu3 %v495_v25  ;;  %v523_v25 = vpop.permute.xlu1 %522 }
 0x243   :  { %559 = vmatpush.msra.mxu3 %v494_v28  ;;  %v518_v28 = vpop.permute.xlu2 %517 }
 0x245   :  { %560 = vmatpush.msra.mxu3 %v493_v30 }
 0x247   :  { %561 = vmatpush.msra.mxu3 %v492_v33  ;;  %v604_v33 = vld [vmem:[%s1201_s9] sm:$0xff] }
 0x249   :  { %562 = vmatpush.msra.mxu3 %v491_v36  ;;  %v607_v36 = vld [vmem:[%s1201_s9 + $0x18] sm:$0xff]  ;;  %v625_v41 = vpop.permute.xlu1 %624 }
 0x24b   :  { %563 = vmatpush.msra.mxu3 %v490_v40  ;;  %v630_v40 = vpop.permute.xlu0 %629  ;;  %v620_v45 = vpop.permute.xlu2 %619 }
 0x24d   :  { %564 = vmatpush.msra.mxu3 %v489_v43 }
 0x24f   :  { %565 = vmatpush.msra.mxu3 %v488_v44 }
 0x251   :  { %566 = vmatpush.msra.mxu3 %v487_v47 }
 0x253   :  { %567 = vmatpush.msra.mxu3 %v486_v51  ;;  %v615_v48 = vpop.permute.xlu0 %614 }
 0x255   :  { %568 = vmatpush.msra.mxu3 %v485_v54  ;;  %v682_v54 = vpop.permute.xlu1 %681 }
 0x257   :  { %569 = vmatpush.msra.mxu3 %v484_v55  ;;  %v684_v55 = vperm.slane %v682_v54, 0 }
 0x259   :  { %570 = vmatpush.msra.mxu3 %v483_v56 }
 0x25a   :  { %571 = vmatmul.f32.vlgmr.msra.gmra.mxu3 %v499_v57 }
 0x262   :  { %574 = vmatmul.f32.gmra.mxu3 %v500_v58 }
 0x26a   :  { %577 = vmatmul.f32.gmra.mxu3 %v501_v59 }
 0x272   :  { %580 = vmatmul.f32.gmra.mxu3 %v502_v60 }
 0x27a   :  { %583 = vmatmul.f32.gmra.mxu3 %v503_v61 }
 0x282   :  { %586 = vmatmul.f32.gmra.mxu3 %v504_v62 }
 0x28a   :  { %589 = vmatmul.f32.gmra.mxu3 %v505_v63 }
 0x292   :  { %592 = vmatmul.f32.gmra.mxu3 %v506_v0 }
 0x2dd   :  { %v572_v1 = vpop.f32.mrf.mxu3 }
 0x2de   :  { %v573_v29 = vadd.f32 %v572_v1, %v518_v28 }
 0x2e0   :  { %v596_v32 = vmax.f32 %v573_v29, 0.0 }
 0x2e5   :  { %v575_v2 = vpop.f32.mrf.mxu3 }
 0x2e6   :  { %v576_v26 = vadd.f32 %v575_v2, %v523_v25 }
 0x2e8   :  { %v597_v31 = vmax.f32 %v576_v26, 0.0 }
 0x2ed   :  { %v578_v3 = vpop.f32.mrf.mxu3 }
 0x2ee   :  { %v579_v23 = vadd.f32 %v578_v3, %v528_v22 }
 0x2f0   :  { %v598_v30 = vmax.f32 %v579_v23, 0.0 }
 0x2f5   :  { %v581_v4 = vpop.f32.mrf.mxu3 }
 0x2f6   :  { %v582_v20 = vadd.f32 %v581_v4, %v533_v15 }
 0x2f8   :  { %v599_v27 = vmax.f32 %v582_v20, 0.0 }
 0x2fd   :  { %v584_v5 = vpop.f32.mrf.mxu3 }
 0x2fe   :  { %v585_v18 = vadd.f32 %v584_v5, %v538_v11 }
 0x300   :  { %v600_v24 = vmax.f32 %v585_v18, 0.0 }
 0x305   :  { %v587_v6 = vpop.f32.mrf.mxu3 }
 0x306   :  { %v588_v16 = vadd.f32 %v587_v6, %v543_v10 }
 0x308   :  { %v601_v21 = vmax.f32 %v588_v16, 0.0 }
 0x30d   :  { %v590_v9 = vpop.f32.mrf.mxu3 }
 0x30e   :  { %v591_v13 = vadd.f32 %v590_v9, %v548_v8 }
 0x310   :  { %v602_v19 = vmax.f32 %v591_v13, 0.0 }
 0x315   :  { %v593_v12 = vpop.f32.mrf.mxu3 }
 0x316   :  { %v594_v14 = vadd.f32 %v593_v12, %v553_v7 }
 0x318   :  { %v603_v17 = vmax.f32 %v594_v14, 0.0 }
 0x31a   :  { %652 = vmatpush.msra.mxu0 %v603_v17 }
 0x31c   :  { %653 = vmatpush.msra.mxu0 %v602_v19 }
 0x31e   :  { %654 = vmatpush.msra.mxu0 %v601_v21 }
 0x320   :  { %655 = vmatpush.msra.mxu0 %v600_v24 }
 0x322   :  { %656 = vmatpush.msra.mxu0 %v599_v27 }
 0x324   :  { %657 = vmatpush.msra.mxu0 %v598_v30 }
 0x326   :  { %658 = vmatpush.msra.mxu0 %v597_v31 }
 0x328   :  { %659 = vmatpush.msra.mxu0 %v596_v32 }
 0x329   :  { %773 = vmatmul.msk.f32.vlgmr.msra.gmra.mxu0 %vm369_vm3, %v604_v33 }
 0x331   :  { %774 = vmatmul.msk.f32.gmra.mxu0 %vm369_vm3, %v605_v34 }
 0x339   :  { %775 = vmatmul.msk.f32.gmra.mxu0 %vm369_vm3, %v606_v35 }
 0x341   :  { %776 = vmatmul.msk.f32.gmra.mxu0 %vm369_vm3, %v607_v36 }
 0x3a6   :  { %v661_v37 = vpop.f32.mrf.mxu0 }
 0x3a7   :  { %v662_v49 = vadd.f32 %v661_v37, %v615_v48 }
 0x3a9   :  { %v673_v52 = vmax.f32 %v662_v49, 0.0 }
 0x3ae   :  { %v664_v38 = vpop.f32.mrf.mxu0 }
 0x3af   :  { %v665_v46 = vadd.f32 %v664_v38, %v620_v45 }
 0x3b1   :  { %v674_v51 = vmax.f32 %v665_v46, 0.0 }
 0x3b6   :  { %v667_v39 = vpop.f32.mrf.mxu0 }
 0x3b7   :  { %v668_v43 = vadd.f32 %v667_v39, %v625_v41 }
 0x3b9   :  { %v675_v50 = vmax.f32 %v668_v43, 0.0 }
 0x3be   :  { %v670_v42 = vpop.f32.mrf.mxu0 }
 0x3bf   :  { %v671_v44 = vadd.f32 %v670_v42, %v630_v40 }
 0x3c1   :  { %v676_v47 = vmax.f32 %v671_v44, 0.0 }
 0x3c3   :  { %700 = vmatpush.msrb.mxu0 %v676_v47 }
 0x3c5   :  { %701 = vmatpush.msrb.mxu0 %v675_v50 }
 0x3c7   :  { %702 = vmatpush.msrb.mxu0 %v674_v51 }
 0x3c9   :  { %703 = vmatpush.msrb.mxu0 %v673_v52 }
 0x3ca   :  { %777 = vmatmul.msk.f32.vlgmr.msrb.gmra.mxu0 %vm183_vm2, %v677_v53 }
 0x447   :  { %v705_v56 = vpop.f32.mrf.mxu0 }
 0x448   :  { %v706_v57 = vadd.f32 %v705_v56, %v684_v55 }
 0x44a   :  { %v778_v58 = vmul.f32 -1.442695, %v706_v57 }
 0x44c   :  { %802 = vpow2.f32 %v778_v58 }
 0x452   :  { %v803_v59 = vpop.eup %802 }
 0x453   :  { %v711_v60 = vadd.f32 1.0, %v803_v59 }
 0x455   :  { %804 = vrcp.f32 %v711_v60  ;;  %v723_v0 = vand.u32 2147483648, %v711_v60  ;;  %v721_v2 = vand.u32 2147483647, %v711_v60  ;;  %vm717_vm5 = vweird.f32 %v711_v60 }
 0x457   :  { %v724_v4 = vor.u32 1.1754944e-38, %v723_v0  ;;  %vm722_vm7 = vcmp.eq.f32.partialorder %v721_v2, 8.507059e+37 }
 0x45b   :  { %v805_v61 = vpop.eup %804 }
 0x45c   :  { %v713_v62 = vmul.f32 %v805_v61, %v711_v60  ;;  %vm718_vm4 = vweird.f32 %v805_v61 }
 0x45d   :  { %vm719_vm6 = vmor %vm717_vm5, %vm718_vm4 }
 0x45e   :  { %v714_v63 = vsub.f32 1.0, %v713_v62 }
 0x460   :  { %v715_v1 = vmul.f32 %v805_v61, %v714_v63 }
 0x462   :  { %v716_v3 = vadd.f32 %v805_v61, %v715_v1 }
 0x464   :  { %v720_v5 = vsel %vm719_vm6, %v805_v61, %v716_v3 }
 0x465   :  { %v725_v6 = vsel %vm722_vm7, %v724_v4, %v720_v5 }
 0x466   :  { %727 = vst [vmem:[#allocation3] sm:$0x1] %v725_v6 }
 0x467   :  { %738 = dma.vmem_to_hbm [thread:$0]  %s734_s29, 16, %s736_s5, [#allocation4]  }
 0x468   :  { %830 = dma.done.wait [#allocation4], 16  }
 0x469   :  { %831 = vsyncadd [#allocation4], 4294967280 }
 0x46a   :  { %743 = vsyncpa [#allocation4], 1 }

</bundles_post_ra>
